<compile_context>
chip_gen: v5e
topology: v5e:2x2
jax: 0.10.0
libtpu: 0.0.40
codegen_flags: <defaults>
</compile_context>

<pallas_src>
import functools

import jax
import jax.numpy as jnp
from jax.experimental import pallas as pl
from jax.experimental.pallas import tpu as pltpu

LEAKY_SLOPE = 0.01   # nn.LeakyReLU default negative_slope
BN_EPS = 1e-5        # nn.BatchNorm1d default eps
LANE = 128           # TPU lane width


def _leaky_relu(x):
    return jnp.where(x > 0, x, LEAKY_SLOPE * x)


# ------------------------------- Pallas kernel ------------------------------- #
# BN is already folded into the weights, so the body is matmul (MXU) + LeakyReLU (VPU).
def densenet_kernel(x_ref, w0_ref, b0_ref, wh_ref, bh_ref, wout_ref, bout_ref,
                    p_ref, *, n_layers):
    # Block 0: Linear -> LeakyReLU (its trailing BN is folded into the next Linear).
    h = jnp.dot(x_ref[...], w0_ref[...], preferred_element_type=jnp.float32) + b0_ref[...]
    h = _leaky_relu(h)

    # Hidden blocks: (Linear + folded BN) -> LeakyReLU, statically unrolled.
    # TODO(synk): switch to lax.fori_loop(..., unroll=True) if n_layers grows large.
    for i in range(n_layers):
        h = jnp.dot(h, wh_ref[i], preferred_element_type=jnp.float32) + bh_ref[i:i + 1, :]
        h = _leaky_relu(h)

    # Output Linear. Output is lane-padded to 128 cols -> full unmasked store.
    p = jnp.dot(h, wout_ref[...], preferred_element_type=jnp.float32) + bout_ref[...]
    p_ref[...] = p.astype(p_ref.dtype)


# --------------------------------- wrapper ----------------------------------- #
def _round_up(v, m):
    return ((v + m - 1) // m) * m


def _fold_batchnorm(params, n_layers):
    """Fold eval-mode BatchNorm (running stats) into adjacent Linear layers."""
    scale = params["gamma"] * jax.lax.rsqrt(params["var"] + BN_EPS)   # (n_layers+1, N)
    shift = params["beta"] - params["mean"] * scale

    w0, b0 = params["w0"], params["b0"]
    wout, bout = params["wout"], params["bout"]

    wh_f, bh_f = [], []
    for i in range(n_layers):
        w = params["wh"][i]
        b = params["bh"][i]
        if i == 0:
            # BN0 sits after block-0's LeakyReLU -> fold on the INPUT side of the
            # first hidden Linear: (h*s0 + t0) @ W + b = h @ (s0[:,None]*W) + (t0 @ W + b)
            b = shift[0] @ w + b
            w = scale[0][:, None] * w
        # BN[i+1] follows this Linear (before LeakyReLU) -> fold on the OUTPUT side.
        wh_f.append(w * scale[i + 1][None, :])
        bh_f.append(b * scale[i + 1] + shift[i + 1])

    if n_layers == 0:
        # BN0 feeds directly into the output Linear.
        bout = (shift[0] @ wout)[None, :] + bout
        wout = scale[0][:, None] * wout
        N = w0.shape[1]
        wh_s = jnp.zeros((1, N, N), jnp.float32)
        bh_s = jnp.zeros((1, N), jnp.float32)
    else:
        wh_s = jnp.stack(wh_f, 0)
        bh_s = jnp.stack(bh_f, 0)
    return w0, b0, wh_s, bh_s, wout, bout


def _pad2(a, rows, cols):
    return jnp.pad(a, ((0, rows - a.shape[0]), (0, cols - a.shape[1])))


def _pick_tb(B):
    # Largest sublane-aligned batch tile up to 128; keep >= 2 grid steps when possible
    # so both v7x TensorCores get work under dimension_semantics=("parallel",).
    if B >= 256:
        return 128
    half = B // 2
    if half >= 8 and half % 8 == 0:
        return half
    return B


def densenet_forward(x, params, *, n_layers, tb=None):
    B, F = x.shape
    N = params["w0"].shape[1]
    out_dim = params["wout"].shape[1]

    f_pad = _round_up(F, LANE)
    n_pad = _round_up(N, LANE)
    o_pad = _round_up(out_dim, LANE)

    w0, b0, wh, bh, wout, bout = _fold_batchnorm(params, n_layers)

    # Zero-pad every feature axis to the 128-lane width. Padded activation lanes stay
    # exactly zero through the whole network (zero weights/biases), so padding never
    # leaks into the real outputs.
    x_p = _pad2(x, B, f_pad)
    w0_p = _pad2(w0, f_pad, n_pad)
    b0_p = _pad2(b0, 1, n_pad)
    wh_p = jnp.pad(wh, ((0, 0), (0, n_pad - wh.shape[1]), (0, n_pad - wh.shape[2])))
    bh_p = _pad2(bh, bh.shape[0], n_pad)
    wout_p = _pad2(wout, n_pad, o_pad)
    bout_p = _pad2(bout, 1, o_pad)

    if tb is None:
        tb = _pick_tb(B)
    assert B % tb == 0 and tb % 8 == 0

    def _full_spec(shape):
        nd = len(shape)
        return pl.BlockSpec(shape, lambda i, _nd=nd: (0,) * _nd)

    grid = (B // tb,)
    in_specs = [
        pl.BlockSpec((tb, f_pad), lambda i: (i, 0)),   # x tile
        _full_spec(w0_p.shape),
        _full_spec(b0_p.shape),
        # TODO(synk): for large N / n_layers (esp. v7x's 64 MiB VMEM) stream wh one layer
        # at a time via an extra "arbitrary" grid axis instead of a full-array spec.
        _full_spec(wh_p.shape),
        _full_spec(bh_p.shape),
        _full_spec(wout_p.shape),
        _full_spec(bout_p.shape),
    ]
    out_specs = pl.BlockSpec((tb, o_pad), lambda i: (i, 0))
    out_shape = jax.ShapeDtypeStruct((B, o_pad), jnp.float32)

    p_pad = pl.pallas_call(
        functools.partial(densenet_kernel, n_layers=n_layers),
        grid=grid,
        in_specs=in_specs,
        out_specs=out_specs,
        out_shape=out_shape,
        compiler_params=pltpu.CompilerParams(dimension_semantics=("parallel",)),
    )(x_p, w0_p, b0_p, wh_p, bh_p, wout_p, bout_p)

    p_hat = p_pad[:, :out_dim]
    # r_hat is a cheap elementwise op on (B, out_dim); do it in plain JAX rather than
    # emitting a second lane-1 output from the kernel.
    r_hat = (1.0 - p_hat) / p_hat
    return r_hat, p_hat


# --------------------------- init & plain-JAX reference ----------------------- #
def init_params(key, input_dim, N, n_layers, out_dim):
    """nn.Linear default U(-1/sqrt(fan_in), 1/sqrt(fan_in)); BN params mildly perturbed
    from PyTorch defaults so the BN-folding path is actually exercised."""
    ks = jax.random.split(key, 2 * (n_layers + 2) + 4)
    ki = iter(ks)

    def linear(kw, kb, fan_in, fan_out):
        bound = 1.0 / jnp.sqrt(jnp.float32(fan_in))
        w = jax.random.uniform(kw, (fan_in, fan_out), jnp.float32, -bound, bound)
        b = jax.random.uniform(kb, (1, fan_out), jnp.float32, -bound, bound)
        return w, b

    w0, b0 = linear(next(ki), next(ki), input_dim, N)
    wh, bh = [], []
    for _ in range(n_layers):
        w, b = linear(next(ki), next(ki), N, N)
        wh.append(w)
        bh.append(b[0])
    wout, bout = linear(next(ki), next(ki), N, out_dim)

    n_bn = n_layers + 1
    gamma = 1.0 + 0.1 * jax.random.normal(next(ki), (n_bn, N), jnp.float32)
    beta = 0.05 * jax.random.normal(next(ki), (n_bn, N), jnp.float32)
    mean = 0.05 * jax.random.normal(next(ki), (n_bn, N), jnp.float32)
    var = 1.0 + 0.1 * jax.random.uniform(next(ki), (n_bn, N), jnp.float32)

    return {
        "w0": w0, "b0": b0,
        "wh": jnp.stack(wh, axis=0) if n_layers > 0 else jnp.zeros((0, N, N), jnp.float32),
        "bh": jnp.stack(bh, axis=0) if n_layers > 0 else jnp.zeros((0, N), jnp.float32),
        "gamma": gamma, "beta": beta, "mean": mean, "var": var,
        "wout": wout, "bout": bout,
    }


def _batchnorm_eval(h, gamma, beta, mean, var):
    inv = jax.lax.rsqrt(var + BN_EPS)
    return (h - mean) * inv * gamma + beta


def densenet_ref(x, params, *, n_layers):
    """Plain-JAX reference (unfused BN) for correctness check."""
    h = x @ params["w0"] + params["b0"]
    h = _leaky_relu(h)
    h = _batchnorm_eval(h, params["gamma"][0], params["beta"][0],
                        params["mean"][0], params["var"][0])
    for i in range(n_layers):
        h = h @ params["wh"][i] + params["bh"][i]
        h = _batchnorm_eval(h, params["gamma"][i + 1], params["beta"][i + 1],
                            params["mean"][i + 1], params["var"][i + 1])
        h = _leaky_relu(h)
    p = h @ params["wout"] + params["bout"]
    r = (1.0 - p) / p
    return r, p


if __name__ == "__main__":
    B, input_dim, N, n_layers, out_dim = 64, 16, 32, 4, 1

    key = jax.random.PRNGKey(0)
    kx, kp = jax.random.split(key)
    x = jax.random.normal(kx, (B, input_dim), jnp.float32)
    params = init_params(kp, input_dim, N, n_layers, out_dim)

    r_hat, p_hat = densenet_forward(x, params, n_layers=n_layers)
    jax.block_until_ready((r_hat, p_hat))

    r_ref, p_ref = densenet_ref(x, params, n_layers=n_layers)
    assert jnp.allclose(p_hat, p_ref, rtol=1e-3, atol=1e-4), "p_hat mismatch"
    # (1 - p)/p is ill-conditioned near p == 0 (flagged fragility of the module itself);
    # check r_hat only where the denominator is not vanishingly small.
    mask = jnp.abs(p_ref) > 1e-3
    assert jnp.allclose(jnp.where(mask, r_hat, 0.0), jnp.where(mask, r_ref, 0.0),
                        rtol=2e-3, atol=2e-3), "r_hat mismatch"

    print("KERNEL_OK")
</pallas_src>

<mosaic_0001>
module attributes {stable_mosaic.version = 11 : i64} {
  func.func @densenet_kernel(%arg0: i32, %arg1: memref<32x128xf32, #tpu.memory_space<vmem>>, %arg2: memref<128x128xf32, #tpu.memory_space<vmem>>, %arg3: memref<1x128xf32, #tpu.memory_space<vmem>>, %arg4: memref<4x128x128xf32, #tpu.memory_space<vmem>>, %arg5: memref<4x128xf32, #tpu.memory_space<vmem>>, %arg6: memref<128x128xf32, #tpu.memory_space<vmem>>, %arg7: memref<1x128xf32, #tpu.memory_space<vmem>>, %arg8: memref<32x128xf32, #tpu.memory_space<vmem>>) attributes {dimension_semantics = [#tpu.dimension_semantics<parallel>], iteration_bounds = array<i64: 2>, scalar_prefetch = 0 : i64, scratch_operands = 0 : i64, tpu.core_type = #tpu.core_type<tc>, window_params = [{transform_indices = @transform_0, window_bounds = array<i64: 32, 128>}, {pipeline_mode = #tpu.pipeline_mode<synchronous>, transform_indices = @transform_1, window_bounds = array<i64: 128, 128>}, {pipeline_mode = #tpu.pipeline_mode<synchronous>, transform_indices = @transform_2, window_bounds = array<i64: 1, 128>}, {pipeline_mode = #tpu.pipeline_mode<synchronous>, transform_indices = @transform_3, window_bounds = array<i64: 4, 128, 128>}, {pipeline_mode = #tpu.pipeline_mode<synchronous>, transform_indices = @transform_4, window_bounds = array<i64: 4, 128>}, {pipeline_mode = #tpu.pipeline_mode<synchronous>, transform_indices = @transform_5, window_bounds = array<i64: 128, 128>}, {pipeline_mode = #tpu.pipeline_mode<synchronous>, transform_indices = @transform_6, window_bounds = array<i64: 1, 128>}, {transform_indices = @transform_7, window_bounds = array<i64: 32, 128>}]} {
    %c0 = arith.constant 0 : index
    %c0_0 = arith.constant 0 : index
    %0 = vector.load %arg1[%c0, %c0_0] : memref<32x128xf32, #tpu.memory_space<vmem>>, vector<32x128xf32>
    %c0_1 = arith.constant 0 : index
    %c0_2 = arith.constant 0 : index
    %1 = vector.load %arg2[%c0_1, %c0_2] : memref<128x128xf32, #tpu.memory_space<vmem>>, vector<128x128xf32>
    %cst = arith.constant dense<0.000000e+00> : vector<32x128xf32>
    %2 = tpu.matmul %0, %1, %cst {dimension_numbers = #tpu.dot_dimension_numbers<[1], [0], [0], [1], [0, 0, 1, 1], [], []>} : vector<32x128xf32>, vector<128x128xf32>, vector<32x128xf32> -> vector<32x128xf32>
    %c0_3 = arith.constant 0 : index
    %c0_4 = arith.constant 0 : index
    %3 = vector.load %arg3[%c0_3, %c0_4] : memref<1x128xf32, #tpu.memory_space<vmem>>, vector<1x128xf32>
    %4 = vector.broadcast %3 : vector<1x128xf32> to vector<32x128xf32>
    %5 = arith.addf %2, %4 : vector<32x128xf32>
    %cst_5 = arith.constant 0.000000e+00 : f32
    %6 = vector.broadcast %cst_5 : f32 to vector<32x128xf32>
    %7 = arith.cmpf ogt, %5, %6 : vector<32x128xf32>
    %cst_6 = arith.constant 0.00999999977 : f32
    %8 = vector.broadcast %cst_6 : f32 to vector<32x128xf32>
    %9 = arith.mulf %8, %5 : vector<32x128xf32>
    %10 = arith.select %7, %5, %9 : vector<32x128xi1>, vector<32x128xf32>
    %c0_7 = arith.constant 0 : index
    %c0_8 = arith.constant 0 : index
    %c0_9 = arith.constant 0 : index
    %11 = vector.load %arg4[%c0_7, %c0_8, %c0_9] : memref<4x128x128xf32, #tpu.memory_space<vmem>>, vector<1x128x128xf32>
    %12 = vector.shape_cast %11 : vector<1x128x128xf32> to vector<128x128xf32>
    %cst_10 = arith.constant dense<0.000000e+00> : vector<32x128xf32>
    %13 = tpu.matmul %10, %12, %cst_10 {dimension_numbers = #tpu.dot_dimension_numbers<[1], [0], [0], [1], [0, 0, 1, 1], [], []>} : vector<32x128xf32>, vector<128x128xf32>, vector<32x128xf32> -> vector<32x128xf32>
    %c0_11 = arith.constant 0 : index
    %c0_12 = arith.constant 0 : index
    %14 = vector.load %arg5[%c0_11, %c0_12] : memref<4x128xf32, #tpu.memory_space<vmem>>, vector<1x128xf32>
    %15 = vector.broadcast %14 : vector<1x128xf32> to vector<32x128xf32>
    %16 = arith.addf %13, %15 : vector<32x128xf32>
    %cst_13 = arith.constant 0.000000e+00 : f32
    %17 = vector.broadcast %cst_13 : f32 to vector<32x128xf32>
    %18 = arith.cmpf ogt, %16, %17 : vector<32x128xf32>
    %cst_14 = arith.constant 0.00999999977 : f32
    %19 = vector.broadcast %cst_14 : f32 to vector<32x128xf32>
    %20 = arith.mulf %19, %16 : vector<32x128xf32>
    %21 = arith.select %18, %16, %20 : vector<32x128xi1>, vector<32x128xf32>
    %c1 = arith.constant 1 : index
    %c0_15 = arith.constant 0 : index
    %c0_16 = arith.constant 0 : index
    %22 = vector.load %arg4[%c1, %c0_15, %c0_16] : memref<4x128x128xf32, #tpu.memory_space<vmem>>, vector<1x128x128xf32>
    %23 = vector.shape_cast %22 : vector<1x128x128xf32> to vector<128x128xf32>
    %cst_17 = arith.constant dense<0.000000e+00> : vector<32x128xf32>
    %24 = tpu.matmul %21, %23, %cst_17 {dimension_numbers = #tpu.dot_dimension_numbers<[1], [0], [0], [1], [0, 0, 1, 1], [], []>} : vector<32x128xf32>, vector<128x128xf32>, vector<32x128xf32> -> vector<32x128xf32>
    %c1_18 = arith.constant 1 : index
    %c0_19 = arith.constant 0 : index
    %25 = vector.load %arg5[%c1_18, %c0_19] : memref<4x128xf32, #tpu.memory_space<vmem>>, vector<1x128xf32>
    %26 = vector.broadcast %25 : vector<1x128xf32> to vector<32x128xf32>
    %27 = arith.addf %24, %26 : vector<32x128xf32>
    %cst_20 = arith.constant 0.000000e+00 : f32
    %28 = vector.broadcast %cst_20 : f32 to vector<32x128xf32>
    %29 = arith.cmpf ogt, %27, %28 : vector<32x128xf32>
    %cst_21 = arith.constant 0.00999999977 : f32
    %30 = vector.broadcast %cst_21 : f32 to vector<32x128xf32>
    %31 = arith.mulf %30, %27 : vector<32x128xf32>
    %32 = arith.select %29, %27, %31 : vector<32x128xi1>, vector<32x128xf32>
    %c2 = arith.constant 2 : index
    %c0_22 = arith.constant 0 : index
    %c0_23 = arith.constant 0 : index
    %33 = vector.load %arg4[%c2, %c0_22, %c0_23] : memref<4x128x128xf32, #tpu.memory_space<vmem>>, vector<1x128x128xf32>
    %34 = vector.shape_cast %33 : vector<1x128x128xf32> to vector<128x128xf32>
    %cst_24 = arith.constant dense<0.000000e+00> : vector<32x128xf32>
    %35 = tpu.matmul %32, %34, %cst_24 {dimension_numbers = #tpu.dot_dimension_numbers<[1], [0], [0], [1], [0, 0, 1, 1], [], []>} : vector<32x128xf32>, vector<128x128xf32>, vector<32x128xf32> -> vector<32x128xf32>
    %c2_25 = arith.constant 2 : index
    %c0_26 = arith.constant 0 : index
    %36 = vector.load %arg5[%c2_25, %c0_26] : memref<4x128xf32, #tpu.memory_space<vmem>>, vector<1x128xf32>
    %37 = vector.broadcast %36 : vector<1x128xf32> to vector<32x128xf32>
    %38 = arith.addf %35, %37 : vector<32x128xf32>
    %cst_27 = arith.constant 0.000000e+00 : f32
    %39 = vector.broadcast %cst_27 : f32 to vector<32x128xf32>
    %40 = arith.cmpf ogt, %38, %39 : vector<32x128xf32>
    %cst_28 = arith.constant 0.00999999977 : f32
    %41 = vector.broadcast %cst_28 : f32 to vector<32x128xf32>
    %42 = arith.mulf %41, %38 : vector<32x128xf32>
    %43 = arith.select %40, %38, %42 : vector<32x128xi1>, vector<32x128xf32>
    %c3 = arith.constant 3 : index
    %c0_29 = arith.constant 0 : index
    %c0_30 = arith.constant 0 : index
    %44 = vector.load %arg4[%c3, %c0_29, %c0_30] : memref<4x128x128xf32, #tpu.memory_space<vmem>>, vector<1x128x128xf32>
    %45 = vector.shape_cast %44 : vector<1x128x128xf32> to vector<128x128xf32>
    %cst_31 = arith.constant dense<0.000000e+00> : vector<32x128xf32>
    %46 = tpu.matmul %43, %45, %cst_31 {dimension_numbers = #tpu.dot_dimension_numbers<[1], [0], [0], [1], [0, 0, 1, 1], [], []>} : vector<32x128xf32>, vector<128x128xf32>, vector<32x128xf32> -> vector<32x128xf32>
    %c3_32 = arith.constant 3 : index
    %c0_33 = arith.constant 0 : index
    %47 = vector.load %arg5[%c3_32, %c0_33] : memref<4x128xf32, #tpu.memory_space<vmem>>, vector<1x128xf32>
    %48 = vector.broadcast %47 : vector<1x128xf32> to vector<32x128xf32>
    %49 = arith.addf %46, %48 : vector<32x128xf32>
    %cst_34 = arith.constant 0.000000e+00 : f32
    %50 = vector.broadcast %cst_34 : f32 to vector<32x128xf32>
    %51 = arith.cmpf ogt, %49, %50 : vector<32x128xf32>
    %cst_35 = arith.constant 0.00999999977 : f32
    %52 = vector.broadcast %cst_35 : f32 to vector<32x128xf32>
    %53 = arith.mulf %52, %49 : vector<32x128xf32>
    %54 = arith.select %51, %49, %53 : vector<32x128xi1>, vector<32x128xf32>
    %c0_36 = arith.constant 0 : index
    %c0_37 = arith.constant 0 : index
    %55 = vector.load %arg6[%c0_36, %c0_37] : memref<128x128xf32, #tpu.memory_space<vmem>>, vector<128x128xf32>
    %cst_38 = arith.constant dense<0.000000e+00> : vector<32x128xf32>
    %56 = tpu.matmul %54, %55, %cst_38 {dimension_numbers = #tpu.dot_dimension_numbers<[1], [0], [0], [1], [0, 0, 1, 1], [], []>} : vector<32x128xf32>, vector<128x128xf32>, vector<32x128xf32> -> vector<32x128xf32>
    %c0_39 = arith.constant 0 : index
    %c0_40 = arith.constant 0 : index
    %57 = vector.load %arg7[%c0_39, %c0_40] : memref<1x128xf32, #tpu.memory_space<vmem>>, vector<1x128xf32>
    %58 = vector.broadcast %57 : vector<1x128xf32> to vector<32x128xf32>
    %59 = arith.addf %56, %58 : vector<32x128xf32>
    %c0_41 = arith.constant 0 : index
    %c0_42 = arith.constant 0 : index
    %60 = vector.load %arg8[%c0_41, %c0_42] : memref<32x128xf32, #tpu.memory_space<vmem>>, vector<32x128xf32>
    tpu.vector_store %arg8[%c0_41, %c0_42], %59 {strides = array<i32>} : memref<32x128xf32, #tpu.memory_space<vmem>>, vector<32x128xf32>,
    return
  }
  func.func @transform_0(%arg0: i32) -> (i32, i32) {
    %c0_i32 = arith.constant 0 : i32
    %c0_i32_0 = arith.constant 0 : i32
    return %arg0, %c0_i32 : i32, i32
  }
  func.func @transform_1(%arg0: i32) -> (i32, i32) {
    %c0_i32 = arith.constant 0 : i32
    %c0_i32_0 = arith.constant 0 : i32
    %c0_i32_1 = arith.constant 0 : i32
    return %c0_i32, %c0_i32_0 : i32, i32
  }
  func.func @transform_2(%arg0: i32) -> (i32, i32) {
    %c0_i32 = arith.constant 0 : i32
    %c0_i32_0 = arith.constant 0 : i32
    %c0_i32_1 = arith.constant 0 : i32
    return %c0_i32, %c0_i32_0 : i32, i32
  }
  func.func @transform_3(%arg0: i32) -> (i32, i32, i32) {
    %c0_i32 = arith.constant 0 : i32
    %c0_i32_0 = arith.constant 0 : i32
    %c0_i32_1 = arith.constant 0 : i32
    %c0_i32_2 = arith.constant 0 : i32
    return %c0_i32, %c0_i32_0, %c0_i32_1 : i32, i32, i32
  }
  func.func @transform_4(%arg0: i32) -> (i32, i32) {
    %c0_i32 = arith.constant 0 : i32
    %c0_i32_0 = arith.constant 0 : i32
    %c0_i32_1 = arith.constant 0 : i32
    return %c0_i32, %c0_i32_0 : i32, i32
  }
  func.func @transform_5(%arg0: i32) -> (i32, i32) {
    %c0_i32 = arith.constant 0 : i32
    %c0_i32_0 = arith.constant 0 : i32
    %c0_i32_1 = arith.constant 0 : i32
    return %c0_i32, %c0_i32_0 : i32, i32
  }
  func.func @transform_6(%arg0: i32) -> (i32, i32) {
    %c0_i32 = arith.constant 0 : i32
    %c0_i32_0 = arith.constant 0 : i32
    %c0_i32_1 = arith.constant 0 : i32
    return %c0_i32, %c0_i32_0 : i32, i32
  }
  func.func @transform_7(%arg0: i32) -> (i32, i32) {
    %c0_i32 = arith.constant 0 : i32
    %c0_i32_0 = arith.constant 0 : i32
    return %arg0, %c0_i32 : i32, i32
  }
}

</mosaic_0001>

<bundles_post_ra>
// kernel: tpu_custom_call.1
= control target key start
LH: loop header
LB: loop body
LE: loop exit
PB: predicated region body
PF: predicated region fallthrough
CT: control target
= control target key end

     0   :  { %s1467_s0 = inlined_call_operand.hbm [shape: f32[64,128], index: 0, kind: input, shape index: {}]   ;;  %s1468_s1 = inlined_call_operand.hbm [shape: f32[128,128], index: 1, kind: input, shape index: {}]   ;;  %s1469_s2 = inlined_call_operand.vmem [shape: f32[1,128], index: 2, kind: input, shape index: {}]   ;;  %s1470_s3 = inlined_call_operand.hbm [shape: f32[4,128,128], index: 3, kind: input, shape index: {}]   ;;  %s1471_s4 = inlined_call_operand.hbm [shape: f32[4,128], index: 4, kind: input, shape index: {}]   ;;  %s1472_s5 = inlined_call_operand.hbm [shape: f32[128,128], index: 5, kind: input, shape index: {}]   ;;  %s1473_s6 = inlined_call_operand.vmem [shape: f32[1,128], index: 6, kind: input, shape index: {}]   ;;  %s1474_s7 = inlined_call_operand.hbm [shape: f32[64,128], index: 7, kind: output, shape index: {}]  }
   0x1   :  { %1477 = sst [smem:[#allocation16_spill]] %s1468_s1 }
   0x2   :  { %12 = vsyncpa [#allocation3], 0 }
   0x3   :  { %14 = vsyncpa [#allocation3 + $0x1], 0 }
   0x4   :  { %15 = vsyncpa [#allocation6], 0 }
   0x5   :  { %16 = vsyncpa [#allocation9], 0 }
   0x6   :  { %17 = vsyncpa [#allocation4], 0 }
   0x7   :  { %19 = vsyncpa [#allocation4 + $0x1], 0  ;;  %s1276_s24 = smov 0   ;;  %s1278_s25 = smov 0  }
   0x8   :  { %s1280_s26 = smov 0   ;;  %s1282_s27 = smov 0  }
   0x9 LB: > { %s1297_s28 = sadd.s32 4294967295, %s1226_s27   ;;  %s849_s29 = sadd.s32 4294967294, %s1226_s27   ;;  %s1226_s27 = sphi %s1282_s27, %s1491_s27   ;;  %s1222_s26 = sphi %s1280_s26, %s1490_s26   ;;  %s1218_s25 = sphi %s1278_s25, %s1489_s25   ;;  %s1214_s24 = sphi %s1276_s24, %s1488_s24  }
   0xa   : > { %p45_p0 = scmp.ne.s32.totalorder %s1218_s25, %s1214_s24  ;;  %p46_p1 = scmp.eq.s32.totalorder %s1297_s28, 0 }
   0xb   : > { %p195_p2 = scmp.eq.s32.totalorder %s1297_s28, 1  ;;  %p201_p3 = scmp.eq.s32.totalorder %s849_s29, 1 }
   0xc   : > { %p1306_p4 = por %p46_p1, %p45_p0  ;;  %p850_p5 = scmp.ge.s32.totalorder %s1226_s27, 1 }
   0xd   : > { %p1311_p6 = por %p201_p3, %p45_p0  ;;  %p208_p7 = scmp.lt.s32.totalorder %s1226_s27, 3 }
   0xe   : > { %s1480_s1 = sld [smem:[#allocation16_spill]]  ;;  %s1228_s13 = smov [#allocation5]  }
   0xf   : > { %p1319_p8 = pnand %p850_p5, %p208_p7  ;;  %s221_s14 = sshll.u32 %s1228_s13, 4  ;;  %s222_s14 = int_to_ptr.vmem [resolvable:$true] %s221_s14 }
  0x10   : > { %s251_s18 = sshll.u32 %s1471_s4, 4  ;;  %s1475_s19 = smov 128   ;;  %s252_s18 = int_to_ptr.hbm [resolvable:$true] %s251_s18 }
  0x11   : > { %p925_p9 = pneg %p1319_p8  ;;  %s1476_s20 = smov 8  }
  0x12   : > { %s1231_s21 = smov [#allocation8]   ;;  %s236_s9 = sshll.u32 %s1470_s3, 4  ;;  %s237_s9 = int_to_ptr.hbm [resolvable:$true] %s236_s9 }
  0x13   : > { %p1327_p10 = pnand %p925_p9, %p46_p1  ;;  %s253_s22 = sshll.u32 %s1231_s21, 4  ;;  %s254_s22 = int_to_ptr.vmem [resolvable:$true] %s253_s22 }
  0x14   : > { %s219_s11 = sshll.u32 %s1480_s1, 4  ;;  %s1233_s17 = smov [#allocation10]   ;;  %s220_s11 = int_to_ptr.hbm [resolvable:$true] %s219_s11 }
  0x15   : > { %928 = dma.hbm_to_vmem [thread:$0]  (!%p1327_p10), %s220_s11, 2048, %s222_s14, [#allocation6], %s1475_s19, %s1475_s19, %s1476_s20  }
  0x16   : > { %934 = dma.hbm_to_vmem [thread:$0]  (!%p1327_p10), %s252_s18, 64, %s254_s22, [#allocation9]  }
  0x17   : > { %s262_s11 = sshll.u32 %s1472_s5, 4  ;;  %s1232_s14 = smov [#allocation7]   ;;  %s263_s11 = int_to_ptr.hbm [resolvable:$true] %s262_s11 }
  0x18   : > { %s238_s16 = sshll.u32 %s1232_s14, 4  ;;  %s264_s18 = sshll.u32 %s1233_s17, 4  ;;  %s239_s16 = int_to_ptr.vmem [resolvable:$true] %s238_s16  ;;  %s265_s18 = int_to_ptr.vmem [resolvable:$true] %s264_s18 }
  0x19   : > { %931 = dma.hbm_to_vmem [thread:$0]  (!%p1327_p10), %s237_s9, 8192, %s239_s16, [#allocation6], %s1475_s19, %s1475_s19, %s1476_s20  }
  0x1a   : > { %937 = dma.hbm_to_vmem [thread:$0]  (!%p1327_p10), %s263_s11, 2048, %s265_s18, [#allocation9], %s1475_s19, %s1475_s19, %s1476_s20  }
  0x1b   : > { %s1359_s21 = sadd.s32 1, %s1226_s27   ;;  %s32_s22 = sadd.s32 1, %s1222_s26 }
  0x1c   : > { %s29_s23 = ssub.s32 %s1226_s27, %s1359_s21  ;;  %p39_p12 = scmp.ne.s32.totalorder %s1222_s26, %s1218_s25 }
  0x1d   : > { %p30_p13 = scmp.eq.s32.totalorder %s29_s23, 0  ;;  %p40_p0 = scmp.eq.s32.totalorder %s1226_s27, 0 }
  0x1e   : > { %p1369_p3 = por %p195_p2, %p39_p12  ;;  %p950_p5 = scmp.lt.s32.totalorder %s1226_s27, 2 }
  0x1f   : > { %s1375_s9 = scalar_select %p30_p13, %s1222_s26, %s32_s22  }
  0x20   : > { %p41_p7 = por %p40_p0, %p39_p12  ;;  %s281_s15 = sand.u32 1, %s1222_s26  }
  0x21   : > { %s856_s10 = sshll.u32 %s281_s15, 5  ;;  %s871_s13 = sshll.u32 %s1226_s27, 5 }
  0x22   : > { %s290_s16 = scalar_lea.hbm %s1467_s0, %s871_s13  ;;  %s285_s17 = scalar_lea.vmem [#allocation2], %s856_s10 }
  0x23   : > { %s293_s18 = sshll.u32 %s285_s17, 4  ;;  %s291_s23 = sshll.u32 %s290_s16, 4  ;;  %s294_s18 = int_to_ptr.vmem [resolvable:$true] %s293_s18  ;;  %s292_s23 = int_to_ptr.hbm [resolvable:$true] %s291_s23 }
  0x24   : > { %p1382_p2 = pnand %p950_p5, %p41_p7  ;;  %s282_s22 = scalar_lea.sflag [#allocation3], %s281_s15 }
  0x25   : > { %s1122_s20 = sshra.s32 %s292_s23, 4  ;;  %s1129_s11 = scalar_lea.hbm %s1467_s0, 64  ;;  %s1123_s20 = int_to_ptr.hbm [resolvable:$true] %s1122_s20 }
  0x26   : > { %s1124_s1 = scalar_lea.hbm %s1123_s20, 32  ;;  %p1126_p10 = pneg %p1382_p2 }
  0x27   : > { %p1125_p9 = scmp.ne.s32.totalorder %s1123_s20, %s1124_s1  ;;  %p1130_p0 = scmp.lt.s32.totalorder %s1123_s20, %s1467_s0 }
  0x28   : > { %p1131_p5 = scmp.lt.s32.totalorder %s1129_s11, %s1124_s1 }
  0x29   : > { %p1127_p12 = pnand %p1126_p10, %p1125_p9 }
  0x2a   : > { %p1132_p7 = por %p1131_p5, %p1130_p0 }
  0x2b   : > { %p1128_p13 = pneg %p1127_p12 }
  0x2d   : > { %p1133_p11 = pnand %p1132_p7, %p1128_p13 }
  0x2f   : > { %1136 = shalt.err (!%p1133_p11)
}
  0x30   : > { %s1485_s15 = smov 8   ;;  %s1486_s17 = smov 128  }
  0x31   : > { %941 = dma.hbm_to_vmem [thread:$0]  (!%p1382_p2), %s292_s23, 512, %s294_s18, %s282_s22, %s1486_s17, %s1486_s17, %s1485_s15  }
  0x32   : > { %305 = sbr.rel (%p1319_p8) target bundleno = 927 (0x39f), region = 48  ;;  %s1402_s13 = sand.u32 (!%p1319_p8), 1, %s1218_s25  }
  0x33   : > { %s860_s1 = sshll.u32 (!%p1319_p8), %s1402_s13, 5  ;;  %s308_s20 = scalar_lea.sflag (!%p1319_p8), [#allocation3], %s1402_s13 }
  0x34   : > { %s1408_s10 = scalar_lea.vmem (!%p1319_p8), [#allocation2], %s860_s1 }
  0x37   : > { %1197 = dma.done.wait (%p1306_p4), %s308_s20, 512  }
  0x38   : > { %1199 = vsyncadd (%p1306_p4), %s308_s20, 4294966784 }
  0x39   : > { %1201 = dma.done.wait (%p46_p1), [#allocation6], 10240  }
  0x3a   : > { %1203 = vsyncadd (%p46_p1), [#allocation6], 4294957056 }
  0x3b   : > { %1205 = dma.done.wait (%p46_p1), [#allocation9], 2112  }
  0x3c   : > { %1207 = vsyncadd (%p46_p1), [#allocation9], 4294965184  ;;  %v384_v0 = vld [vmem:[#allocation5 + $0x78] sm:$0xff]  ;;  %v383_v1 = vld [vmem:[#allocation5 + $0x70] sm:$0xff]  ;;  %s362_s23 = scalar_lea.vmem [#allocation11], %s860_s1  ;;  %s872_s22 = sshll.u32 %s1297_s28, 5 }
  0x3d   : > { %389 = vmatpush.msra.mxu0 %v384_v0  ;;  %v382_v2 = vld [vmem:[#allocation5 + $0x68] sm:$0xff]  ;;  %v381_v3 = vld [vmem:[#allocation5 + $0x60] sm:$0xff]  ;;  %v380_v4 = vld [vmem:[#allocation5 + $0x58] sm:$0xff]  ;;  %s734_s16 = scalar_lea.hbm %s1474_s7, %s872_s22  ;;  %s735_s15 = sshll.u32 %s362_s23, 4  ;;  %s736_s15 = int_to_ptr.vmem [resolvable:$true] %s735_s15 }
  0x3e   : > { %v379_v5 = vld [vmem:[#allocation5 + $0x50] sm:$0xff]  ;;  %v378_v6 = vld [vmem:[#allocation5 + $0x48] sm:$0xff]  ;;  %v377_v7 = vld [vmem:[#allocation5 + $0x40] sm:$0xff]  ;;  %s737_s17 = sshll.u32 %s734_s16, 4  ;;  %s723_s1 = scalar_lea.sflag [#allocation4], %s1402_s13  ;;  %s738_s17 = int_to_ptr.hbm [resolvable:$true] %s737_s17 }
  0x3f   : > { %390 = vmatpush.msra.mxu0 %v383_v1  ;;  %v376_v8 = vld [vmem:[#allocation5 + $0x38] sm:$0xff]  ;;  %v375_v9 = vld [vmem:[#allocation5 + $0x30] sm:$0xff]  ;;  %v374_v10 = vld [vmem:[#allocation5 + $0x28] sm:$0xff]  ;;  %s1166_s20 = sshra.s32 %s738_s17, 4  ;;  %s1172_s12 = scalar_lea.hbm %s1474_s7, 64  ;;  %s1167_s20 = int_to_ptr.hbm [resolvable:$true] %s1166_s20 }
  0x40   : > { %v373_v11 = vld [vmem:[#allocation5 + $0x20] sm:$0xff]  ;;  %v372_v12 = vld [vmem:[#allocation5 + $0x18] sm:$0xff]  ;;  %v371_v13 = vld [vmem:[#allocation5 + $0x10] sm:$0xff]  ;;  %p1173_p11 = scmp.lt.s32.totalorder %s1167_s20, %s1474_s7 }
  0x41   : > { %391 = vmatpush.msra.mxu0 %v382_v2  ;;  %v445_v14 = vld [vmem:[#allocation7 + $0x78] sm:$0xff]  ;;  %v444_v15 = vld [vmem:[#allocation7 + $0x70] sm:$0xff]  ;;  %v370_v16 = vld [vmem:[#allocation5 + $0x8] sm:$0xff] }
  0x42   : > { %448 = vmatpush.msra.mxu1 %v445_v14  ;;  %v443_v17 = vld [vmem:[#allocation7 + $0x68] sm:$0xff]  ;;  %v369_v18 = vld [vmem:[#allocation5] sm:$0xff]  ;;  %v441_v21 = vld [vmem:[#allocation7 + $0x58] sm:$0xff] }
  0x43   : > { %392 = vmatpush.msra.mxu0 %v381_v3  ;;  %v442_v19 = vld [vmem:[#allocation7 + $0x60] sm:$0xff]  ;;  %v440_v22 = vld [vmem:[#allocation7 + $0x50] sm:$0xff]  ;;  %v439_v23 = vld [vmem:[#allocation7 + $0x48] sm:$0xff] }
  0x44   : > { %449 = vmatpush.msra.mxu1 %v444_v15  ;;  %v365_v20 = vld [vmem:[%s1408_s10] sm:$0xff]  ;;  %v366_v25 = vld [vmem:[%s1408_s10 + $0x8] sm:$0xff]  ;;  %v437_v26 = vld [vmem:[#allocation7 + $0x38] sm:$0xff] }
  0x45   : > { %393 = vmatpush.msra.mxu0 %v380_v4  ;;  %v438_v24 = vld [vmem:[#allocation7 + $0x40] sm:$0xff]  ;;  %v436_v27 = vld [vmem:[#allocation7 + $0x30] sm:$0xff]  ;;  %v435_v28 = vld [vmem:[#allocation7 + $0x28] sm:$0xff] }
  0x46   : > { %450 = vmatpush.msra.mxu1 %v443_v17  ;;  %v434_v29 = vld [vmem:[#allocation7 + $0x20] sm:$0xff]  ;;  %v367_v30 = vld [vmem:[%s1408_s10 + $0x10] sm:$0xff]  ;;  %v433_v31 = vld [vmem:[#allocation7 + $0x18] sm:$0xff] }
  0x47   : > { %394 = vmatpush.msra.mxu0 %v379_v5  ;;  %v368_v32 = vld [vmem:[%s1408_s10 + $0x18] sm:$0xff]  ;;  %v432_v33 = vld [vmem:[#allocation7 + $0x10] sm:$0xff]  ;;  %v431_v34 = vld [vmem:[#allocation7 + $0x8] sm:$0xff]  ;;  %s1168_s10 = scalar_lea.hbm %s1167_s20, 32 }
  0x48   : > { %451 = vmatpush.msra.mxu1 %v442_v19  ;;  %v430_v35 = vld [vmem:[#allocation7] sm:$0xff]  ;;  %v505_v37 = vld [vmem:[#allocation7 + $0xf8] sm:$0xff]  ;;  %v504_v38 = vld [vmem:[#allocation7 + $0xf0] sm:$0xff]  ;;  %p1169_p1 = scmp.ne.s32.totalorder %s1167_s20, %s1168_s10  ;;  %p1174_p2 = scmp.lt.s32.totalorder %s1172_s12, %s1168_s10 }
  0x49   : > { %395 = vmatpush.msra.mxu0 %v378_v6  ;;  %v996_v36 = vld [vmem:[%s1469_s2] ss:$0 sm:$0xff]  ;;  %508 = vmatpush.msra.mxu2 %v505_v37  ;;  %v503_v40 = vld [vmem:[#allocation7 + $0xe8] sm:$0xff]  ;;  %v501_v44 = vld [vmem:[#allocation7 + $0xd8] sm:$0xff] }
  0x4a   : > { %452 = vmatpush.msra.mxu1 %v441_v21  ;;  %v502_v42 = vld [vmem:[#allocation7 + $0xe0] sm:$0xff]  ;;  %v500_v46 = vld [vmem:[#allocation7 + $0xd0] sm:$0xff]  ;;  %v499_v48 = vld [vmem:[#allocation7 + $0xc8] sm:$0xff]  ;;  %p1170_p4 = pnand %p1169_p1, %p1369_p3  ;;  %p1175_p9 = por %p1174_p2, %p1173_p11 }
  0x4b   : > { %396 = vmatpush.msra.mxu0 %v377_v7  ;;  %509 = vmatpush.msra.mxu2 %v504_v38  ;;  %v498_v50 = vld [vmem:[#allocation7 + $0xc0] sm:$0xff]  ;;  %v497_v52 = vld [vmem:[#allocation7 + $0xb8] sm:$0xff]  ;;  %v496_v54 = vld [vmem:[#allocation7 + $0xb0] sm:$0xff] }
  0x4c   : > { %453 = vmatpush.msra.mxu1 %v440_v22  ;;  %v495_v56 = vld [vmem:[#allocation7 + $0xa8] sm:$0xff]  ;;  %v494_v58 = vld [vmem:[#allocation7 + $0xa0] sm:$0xff]  ;;  %v493_v60 = vld [vmem:[#allocation7 + $0x98] sm:$0xff]  ;;  %p1171_p8 = pneg %p1170_p4 }
  0x4d   : > { %397 = vmatpush.msra.mxu0 %v376_v8  ;;  %510 = vmatpush.msra.mxu2 %v503_v40  ;;  %v492_v2 = vld [vmem:[#allocation7 + $0x90] sm:$0xff]  ;;  %v491_v3 = vld [vmem:[#allocation7 + $0x88] sm:$0xff]  ;;  %v490_v4 = vld [vmem:[#allocation7 + $0x80] sm:$0xff] }
  0x4e   : > { %454 = vmatpush.msra.mxu1 %v439_v23  ;;  %v997_v5 = vld [vmem:[#allocation8] ss:$0 sm:$0xff]  ;;  %v565_v6 = vld [vmem:[#allocation7 + $0x178] sm:$0xff]  ;;  %v564_v7 = vld [vmem:[#allocation7 + $0x170] sm:$0xff]  ;;  %p1176_p10 = pnand %p1175_p9, %p1171_p8 }
  0x4f   : > { %398 = vmatpush.msra.mxu0 %v375_v9  ;;  %511 = vmatpush.msra.mxu2 %v502_v42  ;;  %v563_v9 = vld [vmem:[#allocation7 + $0x168] sm:$0xff]  ;;  %v560_v15 = vld [vmem:[#allocation7 + $0x150] sm:$0xff]  ;;  %v558_v19 = vld [vmem:[#allocation7 + $0x140] sm:$0xff] }
  0x50   : > { %455 = vmatpush.msra.mxu1 %v438_v24  ;;  %568 = vmatpush.msra.mxu3 %v565_v6  ;;  %v559_v17 = vld [vmem:[#allocation7 + $0x148] sm:$0xff]  ;;  %v557_v21 = vld [vmem:[#allocation7 + $0x138] sm:$0xff]  ;;  %v556_v23 = vld [vmem:[#allocation7 + $0x130] sm:$0xff] }
  0x51   : > { %399 = vmatpush.msra.mxu0 %v374_v10  ;;  %512 = vmatpush.msra.mxu2 %v501_v44  ;;  %v550_v37 = vld [vmem:[#allocation7 + $0x100] sm:$0xff]  ;;  %v624_v40 = vld [vmem:[#allocation7 + $0x1f0] sm:$0xff]  ;;  %v623_v42 = vld [vmem:[#allocation7 + $0x1e8] sm:$0xff] }
  0x52   : > { %456 = vmatpush.msra.mxu1 %v437_v26  ;;  %569 = vmatpush.msra.mxu3 %v564_v7  ;;  %v998_v38 = vld [vmem:[#allocation8 + $0x1] ss:$0 sm:$0xff]  ;;  %v999_v7 = vld [vmem:[#allocation8 + $0x2] ss:$0 sm:$0xff] }
  0x53   : > { %400 = vmatpush.msra.mxu0 %v373_v11  ;;  %513 = vmatpush.msra.mxu2 %v500_v46  ;;  %v562_v11 = vld [vmem:[#allocation7 + $0x160] sm:$0xff]  ;;  %v621_v46 = vld [vmem:[#allocation7 + $0x1d8] sm:$0xff] }
  0x54   : > { %457 = vmatpush.msra.mxu1 %v436_v27  ;;  %570 = vmatpush.msra.mxu3 %v563_v9  ;;  %v554_v27 = vld [vmem:[#allocation7 + $0x120] sm:$0xff]  ;;  %v683_v9 = vld [vmem:[#allocation10 + $0x70] sm:$0xff] }
  0x55   : > { %401 = vmatpush.msra.mxu0 %v372_v12  ;;  %514 = vmatpush.msra.mxu2 %v499_v48  ;;  %v622_v44 = vld [vmem:[#allocation7 + $0x1e0] sm:$0xff]  ;;  %v620_v48 = vld [vmem:[#allocation7 + $0x1d0] sm:$0xff] }
  0x56   : > { %458 = vmatpush.msra.mxu1 %v435_v28  ;;  %571 = vmatpush.msra.mxu3 %v562_v11  ;;  %v610_v6 = vld [vmem:[#allocation7 + $0x180] sm:$0xff]  ;;  %v682_v11 = vld [vmem:[#allocation10 + $0x68] sm:$0xff] }
  0x57   : > { %402 = vmatpush.msra.mxu0 %v371_v13  ;;  %515 = vmatpush.msra.mxu2 %v498_v50  ;;  %v561_v13 = vld [vmem:[#allocation7 + $0x158] sm:$0xff]  ;;  %v619_v50 = vld [vmem:[#allocation7 + $0x1c8] sm:$0xff] }
  0x58   : > { %459 = vmatpush.msra.mxu1 %v434_v29  ;;  %572 = vmatpush.msra.mxu3 %v561_v13  ;;  %v553_v29 = vld [vmem:[#allocation7 + $0x118] sm:$0xff]  ;;  %v681_v13 = vld [vmem:[#allocation10 + $0x60] sm:$0xff] }
  0x59   : > { %403 = vmatpush.msra.mxu0 %v370_v16  ;;  %516 = vmatpush.msra.mxu2 %v497_v52  ;;  %v618_v52 = vld [vmem:[#allocation7 + $0x1c0] sm:$0xff] }
  0x5a   : > { %460 = vmatpush.msra.mxu1 %v433_v31  ;;  %573 = vmatpush.msra.mxu3 %v560_v15  ;;  %v680_v15 = vld [vmem:[#allocation10 + $0x58] sm:$0xff] }
  0x5b   : > { %404 = vmatpush.msra.mxu0 %v369_v18  ;;  %517 = vmatpush.msra.mxu2 %v496_v54  ;;  %v617_v54 = vld [vmem:[#allocation7 + $0x1b8] sm:$0xff] }
  0x5c   : > { %405 = vmatmul.f32.vlgmr.msra.gmra.mxu0 %v365_v20  ;;  %461 = vmatpush.msra.mxu1 %v432_v33 }
  0x5d   : > { %518 = vmatpush.msra.mxu2 %v495_v56  ;;  %574 = vmatpush.msra.mxu3 %v559_v17  ;;  %v616_v56 = vld [vmem:[#allocation7 + $0x1b0] sm:$0xff] }
  0x5e   : > { %462 = vmatpush.msra.mxu1 %v431_v34  ;;  %v679_v17 = vld [vmem:[#allocation10 + $0x50] sm:$0xff] }
  0x5f   : > { %519 = vmatpush.msra.mxu2 %v494_v58  ;;  %575 = vmatpush.msra.mxu3 %v558_v19  ;;  %v615_v58 = vld [vmem:[#allocation7 + $0x1a8] sm:$0xff] }
  0x60   : > { %463 = vmatpush.msra.mxu1 %v430_v35  ;;  %v552_v35 = vld [vmem:[#allocation7 + $0x110] sm:$0xff] }
  0x61   : > { %520 = vmatpush.msra.mxu2 %v493_v60  ;;  %576 = vmatpush.msra.mxu3 %v557_v21  ;;  %v614_v60 = vld [vmem:[#allocation7 + $0x1a0] sm:$0xff]  ;;  %v678_v19 = vld [vmem:[#allocation10 + $0x48] sm:$0xff] }
  0x62   : > { %v677_v21 = vld [vmem:[#allocation10 + $0x40] sm:$0xff] }
  0x63   : > { %521 = vmatpush.msra.mxu2 %v492_v2  ;;  %577 = vmatpush.msra.mxu3 %v556_v23  ;;  %v676_v23 = vld [vmem:[#allocation10 + $0x38] sm:$0xff] }
  0x64   : > { %408 = vmatmul.f32.gmra.mxu0 %v366_v25  ;;  %v555_v25 = vld [vmem:[#allocation7 + $0x128] sm:$0xff] }
  0x65   : > { %522 = vmatpush.msra.mxu2 %v491_v3  ;;  %578 = vmatpush.msra.mxu3 %v555_v25  ;;  %v675_v25 = vld [vmem:[#allocation10 + $0x30] sm:$0xff] }
  0x67   : > { %523 = vmatpush.msra.mxu2 %v490_v4  ;;  %579 = vmatpush.msra.mxu3 %v554_v27  ;;  %v612_v4 = vld [vmem:[#allocation7 + $0x190] sm:$0xff] }
  0x68   : > { %v674_v27 = vld [vmem:[#allocation10 + $0x28] sm:$0xff] }
  0x69   : > { %580 = vmatpush.msra.mxu3 %v553_v29  ;;  %v673_v29 = vld [vmem:[#allocation10 + $0x20] sm:$0xff] }
  0x6b   : > { %581 = vmatpush.msra.mxu3 %v552_v35 }
  0x6c   : > { %411 = vmatmul.f32.gmra.mxu0 %v367_v30 }
  0x74   : > { %414 = vmatmul.f32.gmra.mxu0 %v368_v32 }
  0xd9   : > { %v406_v39 = vpop.f32.mrf.mxu0 }
  0xda   : > { %v407_v41 = vadd.f32 %v996_v36, %v406_v39  ;;  %v625_v39 = vld [vmem:[#allocation7 + $0x1f8] sm:$0xff] }
  0xdb   : > { %628 = vmatpush.msrb.mxu0 %v625_v39  ;;  %873 = vmatpush.msrb.mxu2 %v625_v39  ;;  %v669_v39 = vld [vmem:[#allocation10] sm:$0xff] }
  0xdc   : > { %vm418_vm0 = vcmp.gt.f32.partialorder %v407_v41, 0.0  ;;  %v422_v43 = vmul.f32 0.01, %v407_v41 }
  0xdd   : > { %629 = vmatpush.msrb.mxu0 %v624_v40  ;;  %874 = vmatpush.msrb.mxu2 %v624_v40  ;;  %v1000_v40 = vld [vmem:[#allocation8 + $0x3] ss:$0 sm:$0xff] }
  0xde   : > { %v426_v45 = vsel %vm418_vm0, %v407_v41, %v422_v43 }
  0xdf   : > { %464 = vmatmul.f32.vlgmr.msra.gmra.mxu1 %v426_v45  ;;  %630 = vmatpush.msrb.mxu0 %v623_v42 }
  0xe0   : > { %875 = vmatpush.msrb.mxu2 %v623_v42 }
  0xe1   : > { %v409_v47 = vpop.f32.mrf.mxu0  ;;  %631 = vmatpush.msrb.mxu0 %v622_v44 }
  0xe2   : > { %v410_v49 = vadd.f32 %v996_v36, %v409_v47  ;;  %876 = vmatpush.msrb.mxu2 %v622_v44 }
  0xe3   : > { %632 = vmatpush.msrb.mxu0 %v621_v46 }
  0xe4   : > { %vm419_vm1 = vcmp.gt.f32.partialorder %v410_v49, 0.0  ;;  %v423_v51 = vmul.f32 0.01, %v410_v49  ;;  %877 = vmatpush.msrb.mxu2 %v621_v46 }
  0xe5   : > { %633 = vmatpush.msrb.mxu0 %v620_v48 }
  0xe6   : > { %v427_v53 = vsel %vm419_vm1, %v410_v49, %v423_v51  ;;  %878 = vmatpush.msrb.mxu2 %v620_v48 }
  0xe7   : > { %467 = vmatmul.f32.gmra.mxu1 %v427_v53  ;;  %634 = vmatpush.msrb.mxu0 %v619_v50 }
  0xe8   : > { %879 = vmatpush.msrb.mxu2 %v619_v50 }
  0xe9   : > { %v412_v55 = vpop.f32.mrf.mxu0  ;;  %635 = vmatpush.msrb.mxu0 %v618_v52 }
  0xea   : > { %v413_v57 = vadd.f32 %v996_v36, %v412_v55  ;;  %880 = vmatpush.msrb.mxu2 %v618_v52 }
  0xeb   : > { %636 = vmatpush.msrb.mxu0 %v617_v54 }
  0xec   : > { %vm420_vm2 = vcmp.gt.f32.partialorder %v413_v57, 0.0  ;;  %v424_v59 = vmul.f32 0.01, %v413_v57  ;;  %881 = vmatpush.msrb.mxu2 %v617_v54 }
  0xed   : > { %637 = vmatpush.msrb.mxu0 %v616_v56 }
  0xee   : > { %v428_v61 = vsel %vm420_vm2, %v413_v57, %v424_v59  ;;  %882 = vmatpush.msrb.mxu2 %v616_v56 }
  0xef   : > { %470 = vmatmul.f32.gmra.mxu1 %v428_v61  ;;  %638 = vmatpush.msrb.mxu0 %v615_v58 }
  0xf0   : > { %883 = vmatpush.msrb.mxu2 %v615_v58 }
  0xf1   : > { %v415_v62 = vpop.f32.mrf.mxu0  ;;  %639 = vmatpush.msrb.mxu0 %v614_v60 }
  0xf2   : > { %v416_v63 = vadd.f32 %v996_v36, %v415_v62  ;;  %v551_v36 = vld [vmem:[#allocation7 + $0x108] sm:$0xff]  ;;  %v613_v62 = vld [vmem:[#allocation7 + $0x198] sm:$0xff]  ;;  %884 = vmatpush.msrb.mxu2 %v614_v60 }
  0xf3   : > { %582 = vmatpush.msra.mxu3 %v551_v36  ;;  %640 = vmatpush.msrb.mxu0 %v613_v62 }
  0xf4   : > { %vm421_vm3 = vcmp.gt.f32.partialorder %v416_v63, 0.0  ;;  %v425_v0 = vmul.f32 0.01, %v416_v63  ;;  %885 = vmatpush.msrb.mxu2 %v613_v62 }
  0xf5   : > { %583 = vmatpush.msra.mxu3 %v550_v37  ;;  %641 = vmatpush.msrb.mxu0 %v612_v4  ;;  %v671_v37 = vld [vmem:[#allocation10 + $0x10] sm:$0xff] }
  0xf6   : > { %v429_v1 = vsel %vm421_vm3, %v416_v63, %v425_v0  ;;  %886 = vmatpush.msrb.mxu2 %v612_v4 }
  0xf7   : > { %473 = vmatmul.f32.gmra.mxu1 %v429_v1 }
 0x15c   : > { %v465_v8 = vpop.f32.mrf.mxu1 }
 0x15d   : > { %v466_v10 = vadd.f32 %v997_v5, %v465_v8  ;;  %v684_v8 = vld [vmem:[#allocation10 + $0x78] sm:$0xff] }
 0x15e   : > { %689 = vmatpush.msrb.mxu1 %v684_v8  ;;  %889 = vmatpush.msrb.mxu3 %v684_v8 }
 0x15f   : > { %vm477_vm4 = vcmp.gt.f32.partialorder %v466_v10, 0.0  ;;  %v481_v12 = vmul.f32 0.01, %v466_v10 }
 0x160   : > { %690 = vmatpush.msrb.mxu1 %v683_v9  ;;  %890 = vmatpush.msrb.mxu3 %v683_v9 }
 0x161   : > { %v485_v14 = vsel %vm477_vm4, %v466_v10, %v481_v12 }
 0x162   : > { %524 = vmatmul.f32.vlgmr.msra.gmra.mxu2 %v485_v14  ;;  %691 = vmatpush.msrb.mxu1 %v682_v11 }
 0x163   : > { %891 = vmatpush.msrb.mxu3 %v682_v11 }
 0x164   : > { %v468_v16 = vpop.f32.mrf.mxu1  ;;  %692 = vmatpush.msrb.mxu1 %v681_v13 }
 0x165   : > { %v469_v18 = vadd.f32 %v997_v5, %v468_v16  ;;  %892 = vmatpush.msrb.mxu3 %v681_v13 }
 0x166   : > { %693 = vmatpush.msrb.mxu1 %v680_v15 }
 0x167   : > { %vm478_vm5 = vcmp.gt.f32.partialorder %v469_v18, 0.0  ;;  %v482_v20 = vmul.f32 0.01, %v469_v18  ;;  %893 = vmatpush.msrb.mxu3 %v680_v15 }
 0x168   : > { %694 = vmatpush.msrb.mxu1 %v679_v17 }
 0x169   : > { %v486_v22 = vsel %vm478_vm5, %v469_v18, %v482_v20  ;;  %894 = vmatpush.msrb.mxu3 %v679_v17 }
 0x16a   : > { %527 = vmatmul.f32.gmra.mxu2 %v486_v22  ;;  %695 = vmatpush.msrb.mxu1 %v678_v19 }
 0x16b   : > { %895 = vmatpush.msrb.mxu3 %v678_v19 }
 0x16c   : > { %v471_v24 = vpop.f32.mrf.mxu1  ;;  %696 = vmatpush.msrb.mxu1 %v677_v21 }
 0x16d   : > { %v472_v26 = vadd.f32 %v997_v5, %v471_v24  ;;  %896 = vmatpush.msrb.mxu3 %v677_v21 }
 0x16e   : > { %697 = vmatpush.msrb.mxu1 %v676_v23 }
 0x16f   : > { %vm479_vm6 = vcmp.gt.f32.partialorder %v472_v26, 0.0  ;;  %v483_v28 = vmul.f32 0.01, %v472_v26  ;;  %897 = vmatpush.msrb.mxu3 %v676_v23 }
 0x170   : > { %698 = vmatpush.msrb.mxu1 %v675_v25 }
 0x171   : > { %v487_v30 = vsel %vm479_vm6, %v472_v26, %v483_v28  ;;  %898 = vmatpush.msrb.mxu3 %v675_v25 }
 0x172   : > { %530 = vmatmul.f32.gmra.mxu2 %v487_v30  ;;  %699 = vmatpush.msrb.mxu1 %v674_v27 }
 0x173   : > { %899 = vmatpush.msrb.mxu3 %v674_v27 }
 0x174   : > { %v474_v31 = vpop.f32.mrf.mxu1  ;;  %700 = vmatpush.msrb.mxu1 %v673_v29 }
 0x175   : > { %v475_v32 = vadd.f32 %v997_v5, %v474_v31  ;;  %v611_v5 = vld [vmem:[#allocation7 + $0x188] sm:$0xff]  ;;  %v672_v31 = vld [vmem:[#allocation10 + $0x18] sm:$0xff]  ;;  %900 = vmatpush.msrb.mxu3 %v673_v29 }
 0x176   : > { %642 = vmatpush.msrb.mxu0 %v611_v5  ;;  %887 = vmatpush.msrb.mxu2 %v611_v5 }
 0x177   : > { %vm480_vm7 = vcmp.gt.f32.partialorder %v475_v32, 0.0  ;;  %v484_v33 = vmul.f32 0.01, %v475_v32  ;;  %701 = vmatpush.msrb.mxu1 %v672_v31  ;;  %901 = vmatpush.msrb.mxu3 %v672_v31 }
 0x178   : > { %643 = vmatpush.msrb.mxu0 %v610_v6  ;;  %888 = vmatpush.msrb.mxu2 %v610_v6 }
 0x179   : > { %v488_v34 = vsel %vm480_vm7, %v475_v32, %v484_v33  ;;  %702 = vmatpush.msrb.mxu1 %v671_v37  ;;  %902 = vmatpush.msrb.mxu3 %v671_v37 }
 0x17a   : > { %533 = vmatmul.f32.gmra.mxu2 %v488_v34 }
 0x1e5   : > { %v525_v41 = vpop.f32.mrf.mxu2 }
 0x1e6   : > { %v526_v43 = vadd.f32 %v998_v38, %v525_v41 }
 0x1e8   : > { %vm537_vm8 = vcmp.gt.f32.partialorder %v526_v43, 0.0  ;;  %v541_v45 = vmul.f32 0.01, %v526_v43 }
 0x1ea   : > { %v545_v47 = vsel %vm537_vm8, %v526_v43, %v541_v45 }
 0x1eb   : > { %584 = vmatmul.f32.vlgmr.msra.gmra.mxu3 %v545_v47 }
 0x1ed   : > { %v528_v49 = vpop.f32.mrf.mxu2 }
 0x1ee   : > { %v529_v51 = vadd.f32 %v998_v38, %v528_v49 }
 0x1f0   : > { %vm538_vm9 = vcmp.gt.f32.partialorder %v529_v51, 0.0  ;;  %v542_v53 = vmul.f32 0.01, %v529_v51 }
 0x1f2   : > { %v546_v55 = vsel %vm538_vm9, %v529_v51, %v542_v53 }
 0x1f3   : > { %587 = vmatmul.f32.gmra.mxu3 %v546_v55 }
 0x1f5   : > { %v531_v57 = vpop.f32.mrf.mxu2 }
 0x1f6   : > { %v532_v59 = vadd.f32 %v998_v38, %v531_v57  ;;  %v1001_v57 = vld [vmem:[%s1473_s6] ss:$0 sm:$0xff] }
 0x1f8   : > { %vm539_vm10 = vcmp.gt.f32.partialorder %v532_v59, 0.0  ;;  %v543_v61 = vmul.f32 0.01, %v532_v59 }
 0x1fa   : > { %v547_v63 = vsel %vm539_vm10, %v532_v59, %v543_v61 }
 0x1fb   : > { %590 = vmatmul.f32.gmra.mxu3 %v547_v63 }
 0x1fd   : > { %v534_v0 = vpop.f32.mrf.mxu2 }
 0x1fe   : > { %v535_v1 = vadd.f32 %v998_v38, %v534_v0  ;;  %v670_v38 = vld [vmem:[#allocation10 + $0x8] sm:$0xff] }
 0x1ff   : > { %703 = vmatpush.msrb.mxu1 %v670_v38  ;;  %903 = vmatpush.msrb.mxu3 %v670_v38 }
 0x200   : > { %vm540_vm11 = vcmp.gt.f32.partialorder %v535_v1, 0.0  ;;  %v544_v2 = vmul.f32 0.01, %v535_v1 }
 0x201   : > { %704 = vmatpush.msrb.mxu1 %v669_v39  ;;  %904 = vmatpush.msrb.mxu3 %v669_v39 }
 0x202   : > { %v548_v3 = vsel %vm540_vm11, %v535_v1, %v544_v2 }
 0x203   : > { %593 = vmatmul.f32.gmra.mxu3 %v548_v3 }
 0x26e   : > { %v585_v10 = vpop.f32.mrf.mxu3 }
 0x26f   : > { %v586_v12 = vadd.f32 %v999_v7, %v585_v10 }
 0x271   : > { %v601_v14 = vmul.f32 0.01, %v586_v12  ;;  %vm597_vm12 = vcmp.gt.f32.partialorder %v586_v12, 0.0 }
 0x273   : > { %v605_v16 = vsel %vm597_vm12, %v586_v12, %v601_v14 }
 0x274   : > { %644 = vmatmul.f32.vlgmr.msrb.gmra.mxu0 %v605_v16 }
 0x276   : > { %v588_v18 = vpop.f32.mrf.mxu3 }
 0x277   : > { %v589_v20 = vadd.f32 %v999_v7, %v588_v18 }
 0x279   : > { %vm598_vm13 = vcmp.gt.f32.partialorder %v589_v20, 0.0  ;;  %v602_v22 = vmul.f32 0.01, %v589_v20 }
 0x27b   : > { %v606_v24 = vsel %vm598_vm13, %v589_v20, %v602_v22 }
 0x27c   : > { %647 = vmatmul.f32.gmra.mxu0 %v606_v24 }
 0x27e   : > { %v591_v26 = vpop.f32.mrf.mxu3 }
 0x27f   : > { %v592_v28 = vadd.f32 %v999_v7, %v591_v26 }
 0x281   : > { %v603_v30 = vmul.f32 0.01, %v592_v28  ;;  %vm599_vm14 = vcmp.gt.f32.partialorder %v592_v28, 0.0 }
 0x283   : > { %v607_v32 = vsel %vm599_vm14, %v592_v28, %v603_v30 }
 0x284   : > { %650 = vmatmul.f32.vlgmr.msrb.gmra.mxu2 %v607_v32 }
 0x286   : > { %v594_v33 = vpop.f32.mrf.mxu3 }
 0x287   : > { %v595_v34 = vadd.f32 %v999_v7, %v594_v33 }
 0x289   : > { %vm600_vm15 = vcmp.gt.f32.partialorder %v595_v34, 0.0  ;;  %v604_v35 = vmul.f32 0.01, %v595_v34 }
 0x28b   : > { %v608_v36 = vsel %vm600_vm15, %v595_v34, %v604_v35 }
 0x28c   : > { %653 = vmatmul.f32.gmra.mxu2 %v608_v36 }
 0x2f1   : > { %v645_v41 = vpop.f32.mrf.mxu0 }
 0x2f2   : > { %v646_v42 = vadd.f32 %v1000_v40, %v645_v41 }
 0x2f4   : > { %v661_v43 = vmul.f32 0.01, %v646_v42  ;;  %vm657_vm0 = vcmp.gt.f32.partialorder %v646_v42, 0.0 }
 0x2f6   : > { %v665_v44 = vsel %vm657_vm0, %v646_v42, %v661_v43 }
 0x2f7   : > { %705 = vmatmul.f32.vlgmr.msrb.gmra.mxu1 %v665_v44 }
 0x2f9   : > { %v648_v45 = vpop.f32.mrf.mxu0 }
 0x2fa   : > { %v649_v46 = vadd.f32 %v1000_v40, %v648_v45 }
 0x2fc   : > { %vm658_vm1 = vcmp.gt.f32.partialorder %v649_v46, 0.0  ;;  %v662_v47 = vmul.f32 0.01, %v649_v46 }
 0x2fe   : > { %v666_v48 = vsel %vm658_vm1, %v649_v46, %v662_v47 }
 0x2ff   : > { %708 = vmatmul.f32.gmra.mxu1 %v666_v48 }
 0x307   : > { %v651_v49 = vpop.f32.mrf.mxu2 }
 0x308   : > { %v652_v50 = vadd.f32 %v1000_v40, %v651_v49 }
 0x30a   : > { %v663_v51 = vmul.f32 0.01, %v652_v50  ;;  %vm659_vm2 = vcmp.gt.f32.partialorder %v652_v50, 0.0 }
 0x30c   : > { %v667_v52 = vsel %vm659_vm2, %v652_v50, %v663_v51 }
 0x30d   : > { %711 = vmatmul.f32.vlgmr.msrb.gmra.mxu3 %v667_v52 }
 0x30f   : > { %v654_v53 = vpop.f32.mrf.mxu2 }
 0x310   : > { %v655_v54 = vadd.f32 %v1000_v40, %v654_v53 }
 0x312   : > { %vm660_vm3 = vcmp.gt.f32.partialorder %v655_v54, 0.0  ;;  %v664_v55 = vmul.f32 0.01, %v655_v54 }
 0x314   : > { %v668_v56 = vsel %vm660_vm3, %v655_v54, %v664_v55 }
 0x315   : > { %714 = vmatmul.f32.gmra.mxu3 %v668_v56 }
 0x374   : > { %v706_v58 = vpop.f32.mrf.mxu1 }
 0x375   : > { %v707_v59 = vadd.f32 %v1001_v57, %v706_v58 }
 0x377   : > { %718 = vst [vmem:[%s362_s23] sm:$0xff] %v707_v59 }
 0x37c   : > { %v709_v60 = vpop.f32.mrf.mxu1 }
 0x37d   : > { %v710_v61 = vadd.f32 %v1001_v57, %v709_v60 }
 0x37f   : > { %719 = vst [vmem:[%s362_s23 + $0x8] sm:$0xff] %v710_v61 }
 0x390   : > { %v712_v62 = vpop.f32.mrf.mxu3 }
 0x391   : > { %v713_v63 = vadd.f32 %v1001_v57, %v712_v62 }
 0x393   : > { %720 = vst [vmem:[%s362_s23 + $0x10] sm:$0xff] %v713_v63 }
 0x398   : > { %v715_v0 = vpop.f32.mrf.mxu3 }
 0x399   : > { %v716_v1 = vadd.f32 %v1001_v57, %v715_v0 }
 0x39b   : > { %721 = vst [vmem:[%s362_s23 + $0x18] sm:$0xff] %v716_v1 }
 0x39c   : > { %1179 = shalt.err (!%p1176_p10)
}
 0x39d   : > { %s1234_s13 = smov 128   ;;  %s1235_s23 = smov 8  }
 0x39e   : > { %923 = dma.vmem_to_hbm [thread:$0]  (%p1369_p3), %s736_s15, 512, %s738_s17, %s723_s1, %s1234_s13, %s1234_s13, %s1235_s23  }
 0x39f PF: > { %s752_s22 = sand.u32 1, %s1214_s24   ;;  %p1487_p12 = scmp.ge.s32.totalorder %s1226_s27, 2 }
 0x3a0   : > { %s753_s11 = scalar_lea.sflag [#allocation4], %s752_s22 }
 0x3a1   : > { %p943_p13 = pnand %p1487_p12, %p1311_p6 }
 0x3a3   : > { %p944_p0 = pneg %p943_p13 }
 0x3a5   : > { %1209 = dma.done.wait (%p944_p0), %s753_s11, 512  }
 0x3a6   : > { %1211 = vsyncadd (%p944_p0), %s753_s11, 4294966784  ;;  %p22_p5 = scmp.ge.s32.totalorder %s1359_s21, 4   ;;  %s1488_s24 = smov %s1218_s25 }
 0x3a7   : > { %s1489_s25 = smov %s1222_s26  ;;  %s1490_s26 = smov %s1375_s9 }
 0x3a8   : > { %s1491_s27 = smov %s1359_s21  ;;  %24 = sbr.rel (!%p22_p5) target bundleno = 9 (0x9), region = 112 }
 0x3ad   :  { %759 = vsyncpa [#allocation3], 1 }
 0x3ae   :  { %761 = vsyncpa [#allocation3 + $0x1], 1 }
 0x3af   :  { %762 = vsyncpa [#allocation6], 1 }
 0x3b0   :  { %763 = vsyncpa [#allocation9], 1 }
 0x3b1   :  { %764 = vsyncpa [#allocation4], 1 }
 0x3b2   :  { %766 = vsyncpa [#allocation4 + $0x1], 1 }

</bundles_post_ra>
